<compile_context>
chip_gen: v6e
topology: v6e:2x2x1
jax: 0.10.0
libtpu: 0.0.40
codegen_flags: <defaults>
</compile_context>

<pallas_src>
import functools

import jax
import jax.numpy as jnp
from jax import lax
from jax.experimental import pallas as pl
from jax.experimental.pallas import tpu as pltpu


def _round_up(x, m):
    return (x + m - 1) // m * m


# ----------------------------------------------------------------------------
# Kernel 1: fused encoder head (both clips stacked along batch)
#   global avg pool over spatial -> linear(C,C)+bias -> ReLU -> linear(C,dim)
#   +bias -> L2 normalize along feature dim
#   feats layout: (N, S, C)  (channels on the lane axis)
# ----------------------------------------------------------------------------
def _encoder_head_kernel(feats_ref, w1_ref, b1_ref, w2_ref, b2_ref, out_ref):
    feats = feats_ref[...]                                  # (TB, S, C) f32
    # AdaptiveAvgPool3d((1,1,1)) == mean over all spatial positions (sublane axis)
    pooled = jnp.mean(feats, axis=1)                        # (TB, C)
    # Conv3d(C, C, 1, bias=True) on a 1x1x1 map == linear
    h = jnp.dot(pooled, w1_ref[...],
                preferred_element_type=jnp.float32) + b1_ref[...]
    h = jnp.maximum(h, 0.0)                                 # ReLU
    # Conv3d(C, dim, 1, bias=True)
    z = jnp.dot(h, w2_ref[...],
                preferred_element_type=jnp.float32) + b2_ref[...]
    # F.normalize(z, dim=1): z / max(||z||, eps)  ==  z * rsqrt(max(sumsq, eps^2))
    sumsq = jnp.sum(z * z, axis=-1, keepdims=True)
    out_ref[...] = z * lax.rsqrt(jnp.maximum(sumsq, 1e-24))


def encoder_head(feats, w1, b1, w2, b2, *, tb=8):
    N, S, C = feats.shape
    dim = w2.shape[1]
    tb = min(tb, N)
    assert N % tb == 0
    return pl.pallas_call(
        _encoder_head_kernel,
        out_shape=jax.ShapeDtypeStruct((N, dim), jnp.float32),
        grid=(N // tb,),
        in_specs=[
            pl.BlockSpec((tb, S, C), lambda i: (i, 0, 0)),
            pl.BlockSpec((C, C), lambda i: (0, 0)),
            pl.BlockSpec((1, C), lambda i: (0, 0)),
            pl.BlockSpec((C, dim), lambda i: (0, 0)),
            pl.BlockSpec((1, dim), lambda i: (0, 0)),
        ],
        out_specs=pl.BlockSpec((tb, dim), lambda i: (i, 0)),
        compiler_params=pltpu.CompilerParams(
            dimension_semantics=("parallel",)),
    )(feats, w1, b1, w2, b2)


# ----------------------------------------------------------------------------
# Kernel 2: negative logits, tiled over the queue (K) axis
#   l_neg = (q @ queue) / T     -> lane-dense (B_pad, K) output
# ----------------------------------------------------------------------------
def _l_neg_kernel(q_ref, queue_ref, out_ref, *, inv_t):
    out_ref[...] = jnp.dot(q_ref[...], queue_ref[...],
                           preferred_element_type=jnp.float32) * inv_t


def l_neg_logits(q, queue, temperature, *, tk=2048):
    bp, dim = q.shape
    K = queue.shape[1]
    tk = min(tk, K)
    assert K % tk == 0 and tk % 128 == 0
    kernel = functools.partial(_l_neg_kernel, inv_t=float(1.0 / temperature))
    return pl.pallas_call(
        kernel,
        out_shape=jax.ShapeDtypeStruct((bp, K), jnp.float32),
        grid=(K // tk,),
        in_specs=[
            pl.BlockSpec((bp, dim), lambda j: (0, 0)),
            pl.BlockSpec((dim, tk), lambda j: (0, j)),
        ],
        out_specs=pl.BlockSpec((bp, tk), lambda j: (0, j)),
        compiler_params=pltpu.CompilerParams(
            dimension_semantics=("parallel",)),
    )(q, queue)


# ----------------------------------------------------------------------------
# Kernel 3: positive logits (tiny)
#   l_pos = sum(q * k, axis=-1, keepdims=True) / T
# ----------------------------------------------------------------------------
def _l_pos_kernel(q_ref, k_ref, out_ref, *, inv_t):
    out_ref[...] = jnp.sum(q_ref[...] * k_ref[...],
                           axis=-1, keepdims=True) * inv_t


def l_pos_logits(q, k, temperature):
    bp, _ = q.shape
    vmem = pl.BlockSpec(memory_space=pltpu.MemorySpace.VMEM)
    kernel = functools.partial(_l_pos_kernel, inv_t=float(1.0 / temperature))
    return pl.pallas_call(
        kernel,
        out_shape=jax.ShapeDtypeStruct((bp, 1), jnp.float32),
        in_specs=[vmem, vmem],
        out_specs=vmem,
    )(q, k)


# ----------------------------------------------------------------------------
# Forward wrapper (glue only: clip stacking, padding, concat, labels)
# ----------------------------------------------------------------------------
def infonce_forward(block_feats, w1, b1, w2, b2, queue, temperature=0.07, *,
                    tk=2048):
    """block_feats: (B, 2, S, C) backbone feature maps for the two clips."""
    B = block_feats.shape[0]
    assert block_feats.shape[1] == 2
    # Stack the two clips along batch -> ONE fused encoder-head call.
    # encoder_k == encoder_q at init (no momentum step in eval); batch
    # shuffle/unshuffle compose to identity on a single device.
    x = jnp.concatenate([block_feats[:, 0], block_feats[:, 1]], axis=0)  # (2B,S,C)
    n_pad = _round_up(2 * B, 8)
    x = jnp.pad(x, ((0, n_pad - 2 * B), (0, 0), (0, 0)))
    z = encoder_head(x, w1, b1, w2, b2, tb=8)                 # (n_pad, dim)
    q, k = z[:B], z[B:2 * B]

    # Pad rows to a sublane multiple for the logits matmuls.
    bp = _round_up(B, 8)
    q_pad = jnp.pad(q, ((0, bp - B), (0, 0)))
    k_pad = jnp.pad(k, ((0, bp - B), (0, 0)))

    lpos = l_pos_logits(q_pad, k_pad, temperature)[:B]        # (B, 1)
    lneg = l_neg_logits(q_pad, queue, temperature, tk=tk)[:B] # (B, K)

    # Lane-misaligned concat done once in the wrapper (outside the kernels).
    logits = jnp.concatenate([lpos, lneg], axis=1)            # (B, 1+K)
    labels = jnp.zeros((B,), dtype=jnp.int32)
    return logits, labels


if __name__ == "__main__":
    # Small shapes consistent with the module (dim kept at 128, tiny backbone).
    B = 2             # batch
    C = 64            # backbone feature_size (s3d would be 1024)
    T_, H_, W_ = 2, 4, 4
    S = T_ * H_ * W_  # flattened spatial = 32
    DIM = 128         # projection dim
    K = 256           # queue size (module default 2048, scaled down)
    TEMP = 0.07

    key = jax.random.PRNGKey(0)
    k_feat, k_w1, k_b1, k_w2, k_b2, k_q = jax.random.split(key, 6)

    # Synthetic backbone features for the two clips, layout (B, 2, S, C).
    block_feats = jax.random.normal(k_feat, (B, 2, S, C), dtype=jnp.float32)

    # Projection-head parameters (Conv3d 1x1x1 == linear, stored [in, out]).
    w1 = 0.05 * jax.random.normal(k_w1, (C, C), dtype=jnp.float32)
    b1 = 0.01 * jax.random.normal(k_b1, (1, C), dtype=jnp.float32)
    w2 = 0.05 * jax.random.normal(k_w2, (C, DIM), dtype=jnp.float32)
    b2 = 0.01 * jax.random.normal(k_b2, (1, DIM), dtype=jnp.float32)

    # Queue buffer: randn(dim, K), L2-normalized along dim (axis 0).
    queue = jax.random.normal(k_q, (DIM, K), dtype=jnp.float32)
    queue = queue * lax.rsqrt(
        jnp.maximum(jnp.sum(queue * queue, axis=0, keepdims=True), 1e-24))

    logits, labels = infonce_forward(block_feats, w1, b1, w2, b2, queue, TEMP,
                                     tk=128)  # tk=128 -> grid=(2,) exercised
    logits = jax.block_until_ready(logits)
    labels = jax.block_until_ready(labels)

    assert logits.shape == (B, 1 + K), logits.shape
    assert labels.shape == (B,), labels.shape

    # Pure-JAX reference (high precision) for a sanity check.
    hp = lax.Precision.HIGHEST

    def ref_head(xclip):
        pooled = jnp.mean(xclip, axis=1)
        h = jnp.maximum(jnp.dot(pooled, w1, precision=hp) + b1, 0.0)
        z = jnp.dot(h, w2, precision=hp) + b2
        n = jnp.sqrt(jnp.sum(z * z, axis=-1, keepdims=True))
        return z / jnp.maximum(n, 1e-12)

    q_ref = ref_head(block_feats[:, 0])
    k_ref = ref_head(block_feats[:, 1])
    lp_ref = jnp.sum(q_ref * k_ref, axis=-1, keepdims=True)
    ln_ref = jnp.dot(q_ref, queue, precision=hp)
    ref_logits = jnp.concatenate([lp_ref, ln_ref], axis=1) / TEMP
    assert jnp.allclose(logits, ref_logits, atol=2e-2, rtol=2e-2), (
        float(jnp.max(jnp.abs(logits - ref_logits))))

    print("KERNEL_OK")
</pallas_src>

<mosaic_0001>
module attributes {stable_mosaic.version = 11 : i64} {
  func.func @_encoder_head_kernel(%arg0: i32, %arg1: memref<8x32x64xf32, #tpu.memory_space<vmem>>, %arg2: memref<64x64xf32, #tpu.memory_space<vmem>>, %arg3: memref<1x64xf32, #tpu.memory_space<vmem>>, %arg4: memref<64x128xf32, #tpu.memory_space<vmem>>, %arg5: memref<1x128xf32, #tpu.memory_space<vmem>>, %arg6: memref<8x128xf32, #tpu.memory_space<vmem>>) attributes {dimension_semantics = [#tpu.dimension_semantics<parallel>], iteration_bounds = array<i64: 1>, scalar_prefetch = 0 : i64, scratch_operands = 0 : i64, tpu.core_type = #tpu.core_type<tc>, window_params = [{transform_indices = @transform_0, window_bounds = array<i64: 8, 32, 64>}, {pipeline_mode = #tpu.pipeline_mode<synchronous>, transform_indices = @transform_1, window_bounds = array<i64: 64, 64>}, {pipeline_mode = #tpu.pipeline_mode<synchronous>, transform_indices = @transform_2, window_bounds = array<i64: 1, 64>}, {pipeline_mode = #tpu.pipeline_mode<synchronous>, transform_indices = @transform_3, window_bounds = array<i64: 64, 128>}, {pipeline_mode = #tpu.pipeline_mode<synchronous>, transform_indices = @transform_4, window_bounds = array<i64: 1, 128>}, {transform_indices = @transform_5, window_bounds = array<i64: 8, 128>}]} {
    %c0 = arith.constant 0 : index
    %c0_0 = arith.constant 0 : index
    %c0_1 = arith.constant 0 : index
    %0 = vector.load %arg1[%c0, %c0_0, %c0_1] : memref<8x32x64xf32, #tpu.memory_space<vmem>>, vector<8x32x64xf32>
    %cst = arith.constant dense<0.000000e+00> : vector<8x64xf32>
    %1 = vector.multi_reduction <add>, %0, %cst [1] : vector<8x32x64xf32> to vector<8x64xf32>
    %cst_2 = arith.constant 3.200000e+01 : f32
    %2 = vector.broadcast %cst_2 : f32 to vector<8x64xf32>
    %3 = arith.divf %1, %2 : vector<8x64xf32>
    %c0_3 = arith.constant 0 : index
    %c0_4 = arith.constant 0 : index
    %4 = vector.load %arg2[%c0_3, %c0_4] : memref<64x64xf32, #tpu.memory_space<vmem>>, vector<64x64xf32>
    %cst_5 = arith.constant dense<0.000000e+00> : vector<8x64xf32>
    %5 = tpu.matmul %3, %4, %cst_5 {dimension_numbers = #tpu.dot_dimension_numbers<[1], [0], [0], [1], [0, 0, 1, 1], [], []>} : vector<8x64xf32>, vector<64x64xf32>, vector<8x64xf32> -> vector<8x64xf32>
    %c0_6 = arith.constant 0 : index
    %c0_7 = arith.constant 0 : index
    %6 = vector.load %arg3[%c0_6, %c0_7] : memref<1x64xf32, #tpu.memory_space<vmem>>, vector<1x64xf32>
    %7 = vector.broadcast %6 : vector<1x64xf32> to vector<8x64xf32>
    %8 = arith.addf %5, %7 : vector<8x64xf32>
    %cst_8 = arith.constant 0.000000e+00 : f32
    %9 = vector.broadcast %cst_8 : f32 to vector<8x64xf32>
    %10 = arith.maximumf %8, %9 : vector<8x64xf32>
    %c0_9 = arith.constant 0 : index
    %c0_10 = arith.constant 0 : index
    %11 = vector.load %arg4[%c0_9, %c0_10] : memref<64x128xf32, #tpu.memory_space<vmem>>, vector<64x128xf32>
    %cst_11 = arith.constant dense<0.000000e+00> : vector<8x128xf32>
    %12 = tpu.matmul %10, %11, %cst_11 {dimension_numbers = #tpu.dot_dimension_numbers<[1], [0], [0], [1], [0, 0, 1, 1], [], []>} : vector<8x64xf32>, vector<64x128xf32>, vector<8x128xf32> -> vector<8x128xf32>
    %c0_12 = arith.constant 0 : index
    %c0_13 = arith.constant 0 : index
    %13 = vector.load %arg5[%c0_12, %c0_13] : memref<1x128xf32, #tpu.memory_space<vmem>>, vector<1x128xf32>
    %14 = vector.broadcast %13 : vector<1x128xf32> to vector<8x128xf32>
    %15 = arith.addf %12, %14 : vector<8x128xf32>
    %16 = arith.mulf %15, %15 : vector<8x128xf32>
    %cst_14 = arith.constant dense<0.000000e+00> : vector<8xf32>
    %17 = vector.multi_reduction <add>, %16, %cst_14 [1] : vector<8x128xf32> to vector<8xf32>
    %18 = vector.shape_cast %17 : vector<8xf32> to vector<8x1xf32>
    %cst_15 = arith.constant 1.000000e-24 : f32
    %19 = vector.broadcast %cst_15 : f32 to vector<8x1xf32>
    %20 = arith.maximumf %18, %19 : vector<8x1xf32>
    %21 = math.rsqrt %20 : vector<8x1xf32>
    %22 = vector.broadcast %21 : vector<8x1xf32> to vector<8x128xf32>
    %23 = arith.mulf %15, %22 : vector<8x128xf32>
    %c0_16 = arith.constant 0 : index
    %c0_17 = arith.constant 0 : index
    %24 = vector.load %arg6[%c0_16, %c0_17] : memref<8x128xf32, #tpu.memory_space<vmem>>, vector<8x128xf32>
    tpu.vector_store %arg6[%c0_16, %c0_17], %23 {strides = array<i32>} : memref<8x128xf32, #tpu.memory_space<vmem>>, vector<8x128xf32>,
    return
  }
  func.func @transform_0(%arg0: i32) -> (i32, i32, i32) {
    %c0_i32 = arith.constant 0 : i32
    %c0_i32_0 = arith.constant 0 : i32
    %c0_i32_1 = arith.constant 0 : i32
    return %arg0, %c0_i32, %c0_i32_0 : i32, i32, i32
  }
  func.func @transform_1(%arg0: i32) -> (i32, i32) {
    %c0_i32 = arith.constant 0 : i32
    %c0_i32_0 = arith.constant 0 : i32
    %c0_i32_1 = arith.constant 0 : i32
    return %c0_i32, %c0_i32_0 : i32, i32
  }
  func.func @transform_2(%arg0: i32) -> (i32, i32) {
    %c0_i32 = arith.constant 0 : i32
    %c0_i32_0 = arith.constant 0 : i32
    %c0_i32_1 = arith.constant 0 : i32
    return %c0_i32, %c0_i32_0 : i32, i32
  }
  func.func @transform_3(%arg0: i32) -> (i32, i32) {
    %c0_i32 = arith.constant 0 : i32
    %c0_i32_0 = arith.constant 0 : i32
    %c0_i32_1 = arith.constant 0 : i32
    return %c0_i32, %c0_i32_0 : i32, i32
  }
  func.func @transform_4(%arg0: i32) -> (i32, i32) {
    %c0_i32 = arith.constant 0 : i32
    %c0_i32_0 = arith.constant 0 : i32
    %c0_i32_1 = arith.constant 0 : i32
    return %c0_i32, %c0_i32_0 : i32, i32
  }
  func.func @transform_5(%arg0: i32) -> (i32, i32) {
    %c0_i32 = arith.constant 0 : i32
    %c0_i32_0 = arith.constant 0 : i32
    return %arg0, %c0_i32 : i32, i32
  }
}

</mosaic_0001>

<bundles_post_ra>
// kernel: tpu_custom_call.1
= control target key start
LH: loop header
LB: loop body
LE: loop exit
PB: predicated region body
PF: predicated region fallthrough
CT: control target
= control target key end

     0   :  { %10 = vsyncpa [#allocation3], 0  ;;  %s695_s0 = inlined_call_operand.hbm [shape: f32[8,32,64], index: 0, kind: input, shape index: {}]   ;;  %s696_s1 = inlined_call_operand.hbm [shape: f32[64,64], index: 1, kind: input, shape index: {}]   ;;  %s697_s2 = inlined_call_operand.vmem [shape: f32[1,64], index: 2, kind: input, shape index: {}]   ;;  %s698_s3 = inlined_call_operand.hbm [shape: f32[64,128], index: 3, kind: input, shape index: {}]   ;;  %s699_s4 = inlined_call_operand.vmem [shape: f32[1,128], index: 4, kind: input, shape index: {}]   ;;  %s700_s5 = inlined_call_operand.hbm [shape: f32[8,128], index: 5, kind: output, shape index: {}]  }
   0x1   :  { %11 = vsyncpa [#allocation6], 0 }
   0x2   :  { %12 = vsyncpa [#allocation4], 0  ;;  %s585_s18 = smov [#allocation5]   ;;  %s586_s20 = smov [#allocation2]  }
   0x3   :  { %s30_s19 = sshll.u32 %s585_s18, 4  ;;  %s18_s21 = sshll.u32 %s586_s20, 4  ;;  %s31_s19 = int_to_ptr.vmem [resolvable:$true] %s30_s19  ;;  %s19_s21 = int_to_ptr.vmem [resolvable:$true] %s18_s21 }
   0x4   :  { %s507_s22 = scalar_lea.vmem %s31_s19, 1024  ;;  %p512_p1 = scmp.lt.s32.totalorder %s31_s19, %s31_s19 }
   0x5   :  { %p508_p0 = scmp.ne.s32.totalorder %s31_s19, %s507_s22  ;;  %p513_p2 = scmp.lt.s32.totalorder %s507_s22, %s507_s22 }
   0x7   :  { %p514_p3 = por %p513_p2, %p512_p1 }
   0x9   :  { %p515_p4 = pnand %p514_p3, %p508_p0 }
   0xb   :  { %518 = shalt.err (!%p515_p4)
}
   0xc   :  { %s587_s23 = smov 128   ;;  %s588_s24 = smov 8  }
   0xd   :  { %36 = dma.hbm_to_vmem [thread:$0]  %s696_s1, 1024, %s31_s19, [#allocation6], %s587_s23, %s587_s23, %s588_s24  }
   0xe   :  { %s527_s27 = scalar_lea.vmem %s19_s21, 4096  ;;  %p532_p6 = scmp.lt.s32.totalorder %s19_s21, %s19_s21 }
   0xf   :  { %p528_p5 = scmp.ne.s32.totalorder %s19_s21, %s527_s27  ;;  %p533_p7 = scmp.lt.s32.totalorder %s527_s27, %s527_s27 }
  0x11   :  { %p534_p8 = por %p533_p7, %p532_p6 }
  0x13   :  { %p535_p9 = pnand %p534_p8, %p528_p5 }
  0x15   :  { %538 = shalt.err (!%p535_p9)
}
  0x16   :  { %24 = dma.hbm_to_vmem [thread:$0]  %s695_s0, 4096, %s19_s21, [#allocation3], %s587_s23, %s587_s23, %s588_s24  }
  0x17   :  { %s589_s30 = smov [#allocation7]  }
  0x18   :  { %s44_s6 = sshll.u32 %s589_s30, 4  ;;  %s45_s6 = int_to_ptr.vmem [resolvable:$true] %s44_s6 }
  0x19   :  { %s547_s7 = scalar_lea.vmem %s45_s6, 1024  ;;  %p552_p11 = scmp.lt.s32.totalorder %s45_s6, %s45_s6 }
  0x1a   :  { %p548_p10 = scmp.ne.s32.totalorder %s45_s6, %s547_s7  ;;  %p553_p12 = scmp.lt.s32.totalorder %s547_s7, %s547_s7 }
  0x1c   :  { %p554_p13 = por %p553_p12, %p552_p11 }
  0x1e   :  { %p555_p0 = pnand %p554_p13, %p548_p10 }
  0x20   :  { %558 = shalt.err (!%p555_p0)
}
  0x21   :  { %50 = dma.hbm_to_vmem [thread:$0]  %s698_s3, 1024, %s45_s6, [#allocation6], %s587_s23, %s587_s23, %s588_s24  }
  0x22   :  { %579 = dma.done.wait [#allocation3], 4096  }
  0x23   :  { %580 = vsyncadd [#allocation3], 4294963200 }
  0x24   :  { %581 = dma.done.wait [#allocation6], 2048  }
  0x25   :  { %582 = vsyncadd [#allocation6], 4294965248  ;;  %v590_v0 = vmov 0.0   ;;  %vm591_vm0 = vmmov 0   ;;  %v215_v1 = vld [vmem:[#allocation5 + $0x38] sm:$0xff]  ;;  %v214_v2 = vld [vmem:[#allocation5 + $0x30] sm:$0xff] }
  0x26   :  { %451 = vmatprep.subr.mxu0 %v590_v0  ;;  %467 = vmatprep.mubr.msk.f32.mxu0 %vm591_vm0, %v590_v0  ;;  %vm94_vm1 = vcmask 523264   ;;  %v213_v3 = vld [vmem:[#allocation5 + $0x28] sm:$0xff]  ;;  %v212_v4 = vld [vmem:[#allocation5 + $0x20] sm:$0xff]  ;;  %v64_v7 = vld [vmem:[#allocation2 + $0x10] sm:$0xff]  ;;  %vm231_vm2 = vcmask 1041409   ;;  %vm233_vm3 = vcmask 1042434  }
  0x27   :  { %470 = vmatprep.subr.mxu1 %v590_v0  ;;  %486 = vmatprep.mubr.msk.f32.mxu1 %vm591_vm0, %v590_v0  ;;  %v62_v5 = vld [vmem:[#allocation2] sm:$0xff]  ;;  %v63_v6 = vld [vmem:[#allocation2 + $0x8] sm:$0xff]  ;;  %v65_v8 = vld [vmem:[#allocation2 + $0x18] sm:$0xff]  ;;  %v98_v15 = vsel %vm94_vm1, %v64_v7, 0.0  ;;  %vm235_vm4 = vcmask 1043459   ;;  %vm237_vm5 = vcmask 1044484  }
  0x28   :  { %452 = vmatpush3.msra.mxu0 %v215_v1  ;;  %v95_v9 = vsel %vm94_vm1, %v62_v5, 0.0  ;;  %v211_v10 = vld [vmem:[#allocation5 + $0x18] sm:$0xff]  ;;  %v66_v11 = vld [vmem:[#allocation2 + $0x20] sm:$0xff]  ;;  %v67_v12 = vld [vmem:[#allocation2 + $0x28] sm:$0xff]  ;;  %v96_v14 = vsel %vm94_vm1, %v63_v6, 0.0  ;;  %v100_v16 = vsel %vm94_vm1, %v65_v8, 0.0 }
  0x29   :  { %453 = vmatprep.subr.mxu0 %v590_v0  ;;  %v68_v13 = vld [vmem:[#allocation2 + $0x30] sm:$0xff]  ;;  %v69_v17 = vld [vmem:[#allocation2 + $0x38] sm:$0xff]  ;;  %v70_v18 = vld [vmem:[#allocation2 + $0x40] sm:$0xff]  ;;  %v97_v20 = vadd.f32 %v96_v14, %v95_v9  ;;  %v108_v21 = vsel %vm94_vm1, %v66_v11, 0.0  ;;  %v109_v22 = vsel %vm94_vm1, %v67_v12, 0.0  ;;  %vm239_vm6 = vcmask 1045509  }
  0x2a   :  { %454 = vmatpush3.msra.mxu0 %v214_v2  ;;  %v71_v19 = vld [vmem:[#allocation2 + $0x48] sm:$0xff]  ;;  %v111_v23 = vsel %vm94_vm1, %v68_v13, 0.0  ;;  %v210_v24 = vld [vmem:[#allocation5 + $0x10] sm:$0xff]  ;;  %v73_v26 = vld [vmem:[#allocation2 + $0x58] sm:$0xff]  ;;  %v110_v28 = vadd.f32 %v109_v22, %v108_v21  ;;  %v113_v29 = vsel %vm94_vm1, %v69_v17, 0.0  ;;  %v121_v30 = vsel %vm94_vm1, %v70_v18, 0.0 }
  0x2b   :  { %455 = vmatprep.subr.mxu0 %v590_v0  ;;  %v72_v25 = vld [vmem:[#allocation2 + $0x50] sm:$0xff]  ;;  %v74_v27 = vld [vmem:[#allocation2 + $0x60] sm:$0xff]  ;;  %v122_v31 = vsel %vm94_vm1, %v71_v19, 0.0  ;;  %v75_v32 = vld [vmem:[#allocation2 + $0x68] sm:$0xff]  ;;  %v99_v35 = vadd.f32 %v98_v15, %v97_v20  ;;  %v126_v38 = vsel %vm94_vm1, %v73_v26, 0.0  ;;  %vm241_vm7 = vcmask 1046534  }
  0x2c   :  { %456 = vmatpush3.msra.mxu0 %v213_v3  ;;  %v76_v33 = vld [vmem:[#allocation2 + $0x70] sm:$0xff]  ;;  %v77_v34 = vld [vmem:[#allocation2 + $0x78] sm:$0xff]  ;;  %v123_v36 = vadd.f32 %v122_v31, %v121_v30  ;;  %v124_v37 = vsel %vm94_vm1, %v72_v25, 0.0  ;;  %v78_v39 = vld [vmem:[#allocation2 + $0x80] sm:$0xff]  ;;  %v112_v42 = vadd.f32 %v111_v23, %v110_v28  ;;  %v134_v43 = vsel %vm94_vm1, %v74_v27, 0.0  ;;  %s592_s11 = smov [#allocation8]  }
  0x2d   :  { %457 = vmatprep.subr.mxu0 %v590_v0  ;;  %v79_v40 = vld [vmem:[#allocation2 + $0x88] sm:$0xff]  ;;  %v80_v41 = vld [vmem:[#allocation2 + $0x90] sm:$0xff]  ;;  %v135_v44 = vsel %vm94_vm1, %v75_v32, 0.0  ;;  %v137_v45 = vsel %vm94_vm1, %v76_v33, 0.0  ;;  %v81_v46 = vld [vmem:[#allocation2 + $0x98] sm:$0xff]  ;;  %v101_v48 = vadd.f32 %v100_v16, %v99_v35  ;;  %v139_v51 = vsel %vm94_vm1, %v77_v34, 0.0 }
  0x2e   :  { %458 = vmatpush3.msra.mxu0 %v212_v4  ;;  %v82_v47 = vld [vmem:[#allocation2 + $0xa0] sm:$0xff]  ;;  %v125_v49 = vadd.f32 %v124_v37, %v123_v36  ;;  %v136_v50 = vadd.f32 %v135_v44, %v134_v43  ;;  %v209_v52 = vld [vmem:[#allocation5 + $0x8] sm:$0xff]  ;;  %v114_v53 = vadd.f32 %v113_v29, %v112_v42  ;;  %v147_v54 = vsel %vm94_vm1, %v78_v39, 0.0  ;;  %v84_v58 = vld [vmem:[#allocation2 + $0xb0] sm:$0xff] }
  0x2f   :  { %459 = vmatprep.subr.mxu0 %v590_v0  ;;  %v148_v55 = vsel %vm94_vm1, %v79_v40, 0.0  ;;  %v150_v56 = vsel %vm94_vm1, %v80_v41, 0.0  ;;  %v83_v57 = vld [vmem:[#allocation2 + $0xa8] sm:$0xff]  ;;  %v85_v59 = vld [vmem:[#allocation2 + $0xb8] sm:$0xff]  ;;  %v102_v60 = vrot.slane %v101_v48, 4  ;;  %v208_v1 = vld [vmem:[#allocation5] sm:$0xff] }
  0x30   :  { %460 = vmatpush3.msra.mxu0 %v211_v10  ;;  %v127_v61 = vadd.f32 %v126_v38, %v125_v49  ;;  %v138_v62 = vadd.f32 %v137_v45, %v136_v50  ;;  %v149_v63 = vadd.f32 %v148_v55, %v147_v54  ;;  %v86_v2 = vld [vmem:[#allocation2 + $0xc0] sm:$0xff]  ;;  %v115_v3 = vrot.slane %v114_v53, 4  ;;  %v87_v6 = vld [vmem:[#allocation2 + $0xc8] sm:$0xff]  ;;  %v325_v11 = vld [vmem:[#allocation7 + $0x38] sm:$0xff] }
  0x31   :  { %461 = vmatprep.subr.mxu0 %v590_v0  ;;  %v152_v4 = vsel %vm94_vm1, %v81_v46, 0.0  ;;  %v160_v5 = vsel %vm94_vm1, %v82_v47, 0.0  ;;  %v103_v7 = vadd.f32 %v102_v60, %v101_v48  ;;  %v324_v12 = vld [vmem:[#allocation7 + $0x30] sm:$0xff]  ;;  %v161_v14 = vsel %vm94_vm1, %v83_v57, 0.0  ;;  %471 = vmatpush3.msra.mxu1 %v325_v11  ;;  %v323_v22 = vld [vmem:[#allocation7 + $0x28] sm:$0xff]  ;;  %v89_v27 = vld [vmem:[#allocation2 + $0xd8] sm:$0xff] }
  0x32   :  { %462 = vmatpush3.msra.mxu0 %v210_v24  ;;  %v128_v8 = vrot.slane %v127_v61, 4  ;;  %v140_v9 = vadd.f32 %v139_v51, %v138_v62  ;;  %v151_v10 = vadd.f32 %v150_v56, %v149_v63  ;;  %v116_v13 = vadd.f32 %v115_v3, %v114_v53  ;;  %v88_v17 = vld [vmem:[#allocation2 + $0xd0] sm:$0xff]  ;;  %472 = vmatprep.subr.mxu1 %v590_v0  ;;  %v322_v32 = vld [vmem:[#allocation7 + $0x20] sm:$0xff]  ;;  %v321_v42 = vld [vmem:[#allocation7 + $0x18] sm:$0xff] }
  0x33   :  { %463 = vmatprep.subr.mxu0 %v590_v0  ;;  %v163_v15 = vsel %vm94_vm1, %v84_v58, 0.0  ;;  %v165_v16 = vsel %vm94_vm1, %v85_v59, 0.0  ;;  %v104_v18 = vrot.slane %v103_v7, 2  ;;  %v162_v24 = vadd.f32 %v161_v14, %v160_v5  ;;  %473 = vmatpush3.msra.mxu1 %v324_v12  ;;  %v90_v37 = vld [vmem:[#allocation2 + $0xe0] sm:$0xff]  ;;  %v91_v43 = vld [vmem:[#allocation2 + $0xe8] sm:$0xff]  ;;  %v92_v48 = vld [vmem:[#allocation2 + $0xf0] sm:$0xff] }
  0x34   :  { %464 = vmatpush3.msra.mxu0 %v209_v52  ;;  %v129_v19 = vadd.f32 %v128_v8, %v127_v61  ;;  %v141_v20 = vrot.slane %v140_v9, 4  ;;  %v153_v21 = vadd.f32 %v152_v4, %v151_v10  ;;  %v117_v23 = vrot.slane %v116_v13, 2  ;;  %474 = vmatprep.subr.mxu1 %v590_v0  ;;  %v93_v53 = vld [vmem:[#allocation2 + $0xf8] sm:$0xff] }
  0x35   :  { %465 = vmatprep.subr.mxu0 %v590_v0  ;;  %v173_v25 = vsel %vm94_vm1, %v86_v2, 0.0  ;;  %v174_v26 = vsel %vm94_vm1, %v87_v6, 0.0  ;;  %v105_v28 = vadd.f32 %v104_v18, %v103_v7  ;;  %v164_v34 = vadd.f32 %v163_v15, %v162_v24  ;;  %475 = vmatpush3.msra.mxu1 %v323_v22 }
  0x36   :  { %466 = vmatpush3.msra.mxu0 %v208_v1  ;;  %v130_v29 = vrot.slane %v129_v19, 2  ;;  %v142_v30 = vadd.f32 %v141_v20, %v140_v9  ;;  %v154_v31 = vrot.slane %v153_v21, 4  ;;  %v118_v33 = vadd.f32 %v117_v23, %v116_v13  ;;  %476 = vmatprep.subr.mxu1 %v590_v0 }
  0x37   :  { %v175_v35 = vadd.f32 %v174_v26, %v173_v25  ;;  %v176_v36 = vsel %vm94_vm1, %v88_v17, 0.0  ;;  %v106_v38 = vrot.slane %v105_v28, 1  ;;  %v166_v45 = vadd.f32 %v165_v16, %v164_v34  ;;  %477 = vmatpush3.msra.mxu1 %v322_v32 }
  0x38   :  { %v131_v39 = vadd.f32 %v130_v29, %v129_v19  ;;  %v143_v40 = vrot.slane %v142_v30, 2  ;;  %v155_v41 = vadd.f32 %v154_v31, %v153_v21  ;;  %v119_v44 = vrot.slane %v118_v33, 1  ;;  %478 = vmatprep.subr.mxu1 %v590_v0 }
  0x39   :  { %v177_v46 = vadd.f32 %v176_v36, %v175_v35  ;;  %v178_v47 = vsel %vm94_vm1, %v89_v27, 0.0  ;;  %v107_v49 = vadd.f32 %v106_v38, %v105_v28  ;;  %v167_v55 = vrot.slane %v166_v45, 4  ;;  %479 = vmatpush3.msra.mxu1 %v321_v42  ;;  %v429_v42 = vld [vmem:[%s697_s2] ss:$0 sm:$0xff]  ;;  %s419_s2 = sshll.u32 %s592_s11, 4  ;;  %s420_s2 = int_to_ptr.vmem [resolvable:$true] %s419_s2 }
  0x3a   :  { %v132_v50 = vrot.slane %v131_v39, 1  ;;  %v144_v51 = vadd.f32 %v143_v40, %v142_v30  ;;  %v156_v52 = vrot.slane %v155_v41, 2  ;;  %v120_v54 = vadd.f32 %v119_v44, %v118_v33  ;;  %480 = vmatprep.subr.mxu1 %v590_v0  ;;  %v319_v40 = vld [vmem:[#allocation7 + $0x8] sm:$0xff]  ;;  %s559_s12 = scalar_lea.vmem %s420_s2, 128  ;;  %p564_p2 = scmp.lt.s32.totalorder %s420_s2, %s420_s2 }
  0x3b   :  { %v179_v56 = vadd.f32 %v178_v47, %v177_v46  ;;  %v186_v57 = vsel %vm94_vm1, %v90_v37, 0.0  ;;  %v187_v61 = vsel %vm94_vm1, %v91_v43, 0.0  ;;  %v168_v62 = vadd.f32 %v167_v55, %v166_v45  ;;  %v431_v47 = vld [vmem:[%s699_s4] ss:$0 sm:$0xff]  ;;  %p560_p1 = scmp.ne.s32.totalorder %s420_s2, %s559_s12  ;;  %p565_p3 = scmp.lt.s32.totalorder %s559_s12, %s559_s12 }
  0x3c   :  { %v133_v58 = vadd.f32 %v132_v50, %v131_v39  ;;  %v145_v59 = vrot.slane %v144_v51, 1  ;;  %v157_v60 = vadd.f32 %v156_v52, %v155_v41  ;;  %v188_v1 = vadd.f32 %v187_v61, %v186_v57  ;;  %v320_v39 = vld [vmem:[#allocation7 + $0x10] sm:$0xff]  ;;  %v318_v41 = vld [vmem:[#allocation7] sm:$0xff] }
  0x3d   :  { %v180_v63 = vrot.slane %v179_v56, 4  ;;  %v189_v2 = vsel %vm94_vm1, %v92_v48, 0.0  ;;  %v191_v5 = vsel %vm94_vm1, %v93_v53, 0.0  ;;  %v200_v6 = vmul.f32 0.03125, %v107_v49  ;;  %481 = vmatpush3.msra.mxu1 %v320_v39  ;;  %p566_p4 = por %p565_p3, %p564_p2 }
  0x3e   :  { %v146_v3 = vadd.f32 %v145_v59, %v144_v51  ;;  %v158_v4 = vrot.slane %v157_v60, 1  ;;  %v169_v7 = vrot.slane %v168_v62, 2  ;;  %v190_v9 = vadd.f32 %v189_v2, %v188_v1  ;;  %482 = vmatprep.subr.mxu1 %v590_v0 }
  0x3f   :  { %v181_v8 = vadd.f32 %v180_v63, %v179_v56  ;;  %v201_v10 = vmul.f32 0.03125, %v120_v54  ;;  %v202_v12 = vmul.f32 0.03125, %v133_v58  ;;  %vm243_vm8 = vcmask 1047559   ;;  %483 = vmatpush3.msra.mxu1 %v319_v40  ;;  %p567_p5 = pnand %p566_p4, %p560_p1 }
  0x40   :  { %v159_v11 = vadd.f32 %v158_v4, %v157_v60  ;;  %v203_v13 = vmul.f32 0.03125, %v146_v3  ;;  %v170_v14 = vadd.f32 %v169_v7, %v168_v62  ;;  %v192_v16 = vadd.f32 %v191_v5, %v190_v9  ;;  %484 = vmatprep.subr.mxu1 %v590_v0 }
  0x41   :  { %v182_v15 = vrot.slane %v181_v8, 2  ;;  %v232_v17 = vsel %vm231_vm2, %v201_v10, %v200_v6  ;;  %485 = vmatpush3.msra.mxu1 %v318_v41 }
  0x42   :  { %v234_v18 = vsel %vm233_vm3, %v202_v12, %v232_v17  ;;  %v171_v19 = vrot.slane %v170_v14, 1  ;;  %v193_v21 = vrot.slane %v192_v16, 4  ;;  %v204_v22 = vmul.f32 0.03125, %v159_v11 }
  0x43   :  { %v183_v20 = vadd.f32 %v182_v15, %v181_v8  ;;  %v236_v26 = vsel %vm235_vm4, %v203_v13, %v234_v18 }
  0x44   :  { %v172_v23 = vadd.f32 %v171_v19, %v170_v14  ;;  %v194_v25 = vadd.f32 %v193_v21, %v192_v16  ;;  %v238_v30 = vsel %vm237_vm5, %v204_v22, %v236_v26 }
  0x45   :  { %v184_v24 = vrot.slane %v183_v20, 1 }
  0x46   :  { %v195_v28 = vrot.slane %v194_v25, 2  ;;  %v205_v29 = vmul.f32 0.03125, %v172_v23 }
  0x47   :  { %v185_v27 = vadd.f32 %v184_v24, %v183_v20 }
  0x48   :  { %v196_v31 = vadd.f32 %v195_v28, %v194_v25  ;;  %v240_v34 = vsel %vm239_vm6, %v205_v29, %v238_v30 }
  0x49   :  { %v206_v32 = vmul.f32 0.03125, %v185_v27 }
  0x4a   :  { %v197_v33 = vrot.slane %v196_v31, 1 }
  0x4b   :  { %v242_v36 = vsel %vm241_vm7, %v206_v32, %v240_v34 }
  0x4c   :  { %v198_v35 = vadd.f32 %v197_v33, %v196_v31 }
  0x4e   :  { %v207_v37 = vmul.f32 0.03125, %v198_v35 }
  0x50   :  { %v244_v38 = vsel %vm243_vm8, %v207_v37, %v242_v36 }
  0x51   :  { %468 = vmatmul.mubr.msk.f32.vlgmr.msra.gmra.mxu0 %vm94_vm1, %v244_v38 }
 0x111   :  { %v313_v43 = vpop.f32.mrf.mxu0 }
 0x112   :  { %v314_v44 = vadd.f32 %v429_v42, %v313_v43 }
 0x113   :  { %v469_v45 = vpop.f32.mrf.mxu0 }
 0x114   :  { %v317_v46 = vmax.f32 %v314_v44, 0.0 }
 0x116   :  { %487 = vmatmul.mubr.msk.f32.vlgmr.msra.gmra.mxu1 %vm94_vm1, %v317_v46 }
 0x1d6   :  { %v402_v48 = vpop.f32.mrf.mxu1 }
 0x1d7   :  { %v403_v49 = vadd.f32 %v431_v47, %v402_v48 }
 0x1d8   :  { %v488_v50 = vpop.f32.mrf.mxu1 }
 0x1d9   :  { %v406_v0 = vmul.f32 %v403_v49, %v403_v49 }
 0x1db   :  { %407 = vadd.xlane.f32.xlu0 %v406_v0 }
 0x264   :  { %v408_v51 = vpop.xlane.xlu0 %407 }
 0x265   :  { %v409_v52 = vmax.f32 %v408_v51, 1e-24 }
 0x267   :  { %497 = vrsqrt.f32 %v409_v52 }
 0x274   :  { %v498_v53 = vpop.eup %497 }
 0x275   :  { %v411_v54 = vmul.f32 %v498_v53, %v403_v49 }
 0x277   :  { %412 = vst [vmem:[#allocation8] sm:$0xff] %v411_v54 }
 0x278   :  { %570 = shalt.err (!%p567_p5)
}
 0x279   :  { %422 = dma.vmem_to_hbm [thread:$0]  %s420_s2, 128, %s700_s5, [#allocation4]  }
 0x27a   :  { %583 = dma.done.wait [#allocation4], 128  }
 0x27b   :  { %584 = vsyncadd [#allocation4], 4294967168 }
 0x27c   :  { %426 = vsyncpa [#allocation3], 1 }
 0x27d   :  { %427 = vsyncpa [#allocation6], 1 }
 0x27e   :  { %428 = vsyncpa [#allocation4], 1 }

</bundles_post_ra>
